<compile_context>
chip_gen: v7x
topology: tpu7x:2x2x1
jax: 0.10.0
libtpu: 0.0.40
codegen_flags: <defaults>
</compile_context>

<pallas_src>
import functools

import jax
import jax.numpy as jnp
from jax.experimental import pallas as pl
from jax.experimental.pallas import tpu as pltpu


def fused_conv_bn_relu_pool_kernel(a_ref, b_ref, gamma_ref, beta_ref,
                                   feat_ref, hpool_ref, *, count, width, ch, eps):
    # a_ref:      (N*H, W*9*Cin)  bf16  im2col rows
    # b_ref:      (W*9*Cin, W*C)  bf16  block-diagonal conv weight
    # gamma/beta: (1, W*C)        f32   per-channel affine, tiled across W
    # feat_ref:   (N*H, W*C)      f32   BN + ReLU activations (lane-dense)
    # hpool_ref:  (N*H//2, W*C)   f32   H-direction 2x1 max (lane-dense)
    wc = width * ch
    inv_count = 1.0 / count

    def width_allreduce(row):
        # row: (1, wc) per-(w, c) values -> (1, wc) where EVERY lane holds its channel's
        # total across all W positions.  log2(W) XLU rotations + VPU adds; result is
        # already broadcast across W, so no concatenate/tile is needed afterwards.
        r = jnp.broadcast_to(row, (8, wc))          # pad to a native (8, 128) tile
        shift = ch
        while shift < wc:                            # requires W to be a power of two
            r = r + pltpu.roll(r, shift=shift, axis=1)
            shift *= 2
        return r[0:1, :]

    # 3x3 conv (pad=1) as a single lane-dense MXU matmul, bf16 in / f32 accumulate.
    # (Conv bias omitted: it cancels exactly under training-mode BatchNorm.)
    y = jnp.dot(a_ref[...], b_ref[...], preferred_element_type=jnp.float32)   # (NH, W*C)

    # ---- BatchNorm2d batch statistics (training mode), two-pass ----
    col_sum = jnp.sum(y, axis=0, keepdims=True)                # (1, W*C) per-(w,c) sums
    mean_wc = width_allreduce(col_sum) * inv_count             # (1, W*C), per-channel mean

    centered = y - mean_wc
    sq_sum = jnp.sum(centered * centered, axis=0, keepdims=True)
    var_wc = width_allreduce(sq_sum) * inv_count
    scale_wc = jax.lax.rsqrt(var_wc + eps) * gamma_ref[...]    # gamma folded into inv-std

    # ---- BN affine + ReLU (lane-dense) ----
    feat = jnp.maximum(centered * scale_wc + beta_ref[...], 0.0)
    feat_ref[...] = feat

    # ---- H-direction 2x1 max pool from the in-register value; lane-dense store ----
    nh = feat.shape[0]
    pairs = feat.reshape(nh // 2, 2, wc)                       # adjacent rows = (h, h+1)
    hpool_ref[...] = jnp.maximum(pairs[:, 0, :], pairs[:, 1, :])


def light_down_block(x_nchw, w, b, gamma, beta, eps=1e-5):
    N, Cin, H, W = x_nchw.shape
    Cout = w.shape[0]
    K = 9 * Cin
    WC = W * Cout
    NH = N * H
    assert H % 2 == 0 and W % 2 == 0 and (W & (W - 1)) == 0, "H even, W even power of two"

    # ---- wrapper-side layout prep (tiny; XLA fuses transpose/pad/im2col) ----
    x_nhwc = jnp.transpose(x_nchw, (0, 2, 3, 1)).astype(jnp.float32)
    xpad = jnp.pad(x_nhwc, ((0, 0), (1, 1), (1, 1), (0, 0)))
    taps = [xpad[:, ky:ky + H, kx:kx + W, :] for ky in range(3) for kx in range(3)]
    patches = jnp.stack(taps, axis=3)                          # (N, H, W, 9, Cin)
    a_mat = patches.reshape(NH, W * K).astype(jnp.bfloat16)    # (N*H, W*9*Cin)

    # Block-diagonal conv weight: block w holds the (9*Cin, Cout) kernel so one matmul
    # produces the lane-fused (N*H, W*Cout) conv output directly.
    wt = jnp.transpose(w, (2, 3, 1, 0)).reshape(K, Cout).astype(jnp.float32)
    b_mat = jnp.einsum("kc,wv->wkvc", wt, jnp.eye(W, dtype=jnp.float32))
    b_mat = b_mat.reshape(W * K, WC).astype(jnp.bfloat16)      # (W*9*Cin, W*Cout)

    gamma_wc = jnp.tile(gamma.astype(jnp.float32), W).reshape(1, WC)
    beta_wc = jnp.tile(beta.astype(jnp.float32), W).reshape(1, WC)
    del b  # conv bias cancels exactly in training-mode BN -> not passed to the kernel

    kern = functools.partial(fused_conv_bn_relu_pool_kernel,
                             count=float(N * H * W), width=W, ch=Cout, eps=eps)

    feat2d, hpool2d = pl.pallas_call(
        kern,
        out_shape=(jax.ShapeDtypeStruct((NH, WC), jnp.float32),
                   jax.ShapeDtypeStruct((NH // 2, WC), jnp.float32)),
        grid=(1,),
        in_specs=[
            pl.BlockSpec((NH, W * K), lambda i: (0, 0)),
            pl.BlockSpec((W * K, WC), lambda i: (0, 0)),
            pl.BlockSpec((1, WC), lambda i: (0, 0)),
            pl.BlockSpec((1, WC), lambda i: (0, 0)),
        ],
        out_specs=(
            pl.BlockSpec((NH, WC), lambda i: (0, 0)),
            pl.BlockSpec((NH // 2, WC), lambda i: (0, 0)),
        ),
        compiler_params=pltpu.CompilerParams(dimension_semantics=("arbitrary",)),
    )(a_mat, b_mat, gamma_wc, beta_wc)

    feat_nchw = jnp.transpose(feat2d.reshape(N, H, W, Cout), (0, 3, 1, 2))
    # W-direction pair max + de-interleave (pure layout work, fuses with the transpose).
    pool_nhwc = jnp.max(hpool2d.reshape(N, H // 2, W // 2, 2, Cout), axis=3)
    pool_nchw = jnp.transpose(pool_nhwc, (0, 3, 1, 2))
    return pool_nchw, feat_nchw


def reference(x_nchw, w, b, gamma, beta, eps=1e-5):
    y = jax.lax.conv_general_dilated(
        x_nchw, w, window_strides=(1, 1), padding="SAME",
        dimension_numbers=("NCHW", "OIHW", "NCHW"))
    y = y + b[None, :, None, None]
    mean = jnp.mean(y, axis=(0, 2, 3))
    var = jnp.mean((y - mean[None, :, None, None]) ** 2, axis=(0, 2, 3))
    xh = (y - mean[None, :, None, None]) / jnp.sqrt(var[None, :, None, None] + eps)
    xh = xh * gamma[None, :, None, None] + beta[None, :, None, None]
    feat = jnp.maximum(xh, 0.0)
    pool = jax.lax.reduce_window(feat, -jnp.inf, jax.lax.max,
                                 (1, 1, 2, 2), (1, 1, 2, 2), "VALID")
    return pool, feat


if __name__ == "__main__":
    key = jax.random.PRNGKey(0)
    k1, k2, k3, k4, k5 = jax.random.split(key, 5)
    N, Cin, Cout, H, W = 2, 4, 8, 16, 16

    x = jax.random.normal(k1, (N, Cin, H, W), jnp.float32)
    conv_w = 0.1 * jax.random.normal(k2, (Cout, Cin, 3, 3), jnp.float32)
    conv_b = 0.1 * jax.random.normal(k3, (Cout,), jnp.float32)
    gamma = 1.0 + 0.1 * jax.random.normal(k4, (Cout,), jnp.float32)
    beta = 0.1 * jax.random.normal(k5, (Cout,), jnp.float32)

    pool, feat = light_down_block(x, conv_w, conv_b, gamma, beta)
    jax.block_until_ready((pool, feat))

    pool_r, feat_r = reference(x, conv_w, conv_b, gamma, beta)
    assert pool.shape == (N, Cout, H // 2, W // 2)
    assert feat.shape == (N, Cout, H, W)
    # Conv operands are bf16 (f32 accumulation), so compare at a bf16-appropriate tolerance.
    assert bool(jnp.allclose(feat, feat_r, atol=2e-2, rtol=2e-2))
    assert bool(jnp.allclose(pool, pool_r, atol=2e-2, rtol=2e-2))
    print("KERNEL_OK")
</pallas_src>

<mosaic_0001>
module attributes {stable_mosaic.version = 11 : i64} {
  func.func @fused_conv_bn_relu_pool_kernel(%arg0: i32, %arg1: memref<32x576xbf16, #tpu.memory_space<vmem>>, %arg2: memref<576x128xbf16, #tpu.memory_space<vmem>>, %arg3: memref<1x128xf32, #tpu.memory_space<vmem>>, %arg4: memref<1x128xf32, #tpu.memory_space<vmem>>, %arg5: memref<32x128xf32, #tpu.memory_space<vmem>>, %arg6: memref<16x128xf32, #tpu.memory_space<vmem>>) attributes {dimension_semantics = [#tpu.dimension_semantics<arbitrary>], iteration_bounds = array<i64: 1>, scalar_prefetch = 0 : i64, scratch_operands = 0 : i64, tpu.core_type = #tpu.core_type<tc>, window_params = [{pipeline_mode = #tpu.pipeline_mode<synchronous>, transform_indices = @transform_0, window_bounds = array<i64: 32, 576>}, {pipeline_mode = #tpu.pipeline_mode<synchronous>, transform_indices = @transform_1, window_bounds = array<i64: 576, 128>}, {pipeline_mode = #tpu.pipeline_mode<synchronous>, transform_indices = @transform_2, window_bounds = array<i64: 1, 128>}, {pipeline_mode = #tpu.pipeline_mode<synchronous>, transform_indices = @transform_3, window_bounds = array<i64: 1, 128>}, {pipeline_mode = #tpu.pipeline_mode<synchronous>, transform_indices = @transform_4, window_bounds = array<i64: 32, 128>}, {pipeline_mode = #tpu.pipeline_mode<synchronous>, transform_indices = @transform_5, window_bounds = array<i64: 16, 128>}]} {
    %c0 = arith.constant 0 : index
    %c0_0 = arith.constant 0 : index
    %0 = vector.load %arg1[%c0, %c0_0] : memref<32x576xbf16, #tpu.memory_space<vmem>>, vector<32x576xbf16>
    %c0_1 = arith.constant 0 : index
    %c0_2 = arith.constant 0 : index
    %1 = vector.load %arg2[%c0_1, %c0_2] : memref<576x128xbf16, #tpu.memory_space<vmem>>, vector<576x128xbf16>
    %cst = arith.constant dense<0.000000e+00> : vector<32x128xf32>
    %2 = tpu.matmul %0, %1, %cst {dimension_numbers = #tpu.dot_dimension_numbers<[1], [0], [0], [1], [0, 0, 1, 1], [], []>} : vector<32x576xbf16>, vector<576x128xbf16>, vector<32x128xf32> -> vector<32x128xf32>
    %cst_3 = arith.constant dense<0.000000e+00> : vector<128xf32>
    %3 = vector.multi_reduction <add>, %2, %cst_3 [0] : vector<32x128xf32> to vector<128xf32>
    %4 = vector.shape_cast %3 : vector<128xf32> to vector<1x128xf32>
    %5 = vector.shape_cast %4 : vector<1x128xf32> to vector<1x128xf32>
    %6 = vector.broadcast %5 : vector<1x128xf32> to vector<8x128xf32>
    %c8_i32 = arith.constant 8 : i32
    %7 = tpu.dynamic_rotate %6 by %c8_i32 dim 1 : vector<8x128xf32>, i32 -> vector<8x128xf32>
    %8 = arith.addf %6, %7 : vector<8x128xf32>
    %c16_i32 = arith.constant 16 : i32
    %9 = tpu.dynamic_rotate %8 by %c16_i32 dim 1 : vector<8x128xf32>, i32 -> vector<8x128xf32>
    %10 = arith.addf %8, %9 : vector<8x128xf32>
    %c32_i32 = arith.constant 32 : i32
    %11 = tpu.dynamic_rotate %10 by %c32_i32 dim 1 : vector<8x128xf32>, i32 -> vector<8x128xf32>
    %12 = arith.addf %10, %11 : vector<8x128xf32>
    %c64_i32 = arith.constant 64 : i32
    %13 = tpu.dynamic_rotate %12 by %c64_i32 dim 1 : vector<8x128xf32>, i32 -> vector<8x128xf32>
    %14 = arith.addf %12, %13 : vector<8x128xf32>
    %15 = vector.extract_strided_slice %14 {offsets = [0, 0], sizes = [1, 128], strides = [1, 1]} : vector<8x128xf32> to vector<1x128xf32>
    %cst_4 = arith.constant 0.001953125 : f32
    %16 = vector.broadcast %cst_4 : f32 to vector<1x128xf32>
    %17 = arith.mulf %15, %16 : vector<1x128xf32>
    %18 = vector.broadcast %17 : vector<1x128xf32> to vector<32x128xf32>
    %19 = arith.subf %2, %18 : vector<32x128xf32>
    %20 = arith.mulf %19, %19 : vector<32x128xf32>
    %cst_5 = arith.constant dense<0.000000e+00> : vector<128xf32>
    %21 = vector.multi_reduction <add>, %20, %cst_5 [0] : vector<32x128xf32> to vector<128xf32>
    %22 = vector.shape_cast %21 : vector<128xf32> to vector<1x128xf32>
    %23 = vector.shape_cast %22 : vector<1x128xf32> to vector<1x128xf32>
    %24 = vector.broadcast %23 : vector<1x128xf32> to vector<8x128xf32>
    %c8_i32_6 = arith.constant 8 : i32
    %25 = tpu.dynamic_rotate %24 by %c8_i32_6 dim 1 : vector<8x128xf32>, i32 -> vector<8x128xf32>
    %26 = arith.addf %24, %25 : vector<8x128xf32>
    %c16_i32_7 = arith.constant 16 : i32
    %27 = tpu.dynamic_rotate %26 by %c16_i32_7 dim 1 : vector<8x128xf32>, i32 -> vector<8x128xf32>
    %28 = arith.addf %26, %27 : vector<8x128xf32>
    %c32_i32_8 = arith.constant 32 : i32
    %29 = tpu.dynamic_rotate %28 by %c32_i32_8 dim 1 : vector<8x128xf32>, i32 -> vector<8x128xf32>
    %30 = arith.addf %28, %29 : vector<8x128xf32>
    %c64_i32_9 = arith.constant 64 : i32
    %31 = tpu.dynamic_rotate %30 by %c64_i32_9 dim 1 : vector<8x128xf32>, i32 -> vector<8x128xf32>
    %32 = arith.addf %30, %31 : vector<8x128xf32>
    %33 = vector.extract_strided_slice %32 {offsets = [0, 0], sizes = [1, 128], strides = [1, 1]} : vector<8x128xf32> to vector<1x128xf32>
    %cst_10 = arith.constant 0.001953125 : f32
    %34 = vector.broadcast %cst_10 : f32 to vector<1x128xf32>
    %35 = arith.mulf %33, %34 : vector<1x128xf32>
    %cst_11 = arith.constant 9.99999974E-6 : f32
    %36 = vector.broadcast %cst_11 : f32 to vector<1x128xf32>
    %37 = arith.addf %35, %36 : vector<1x128xf32>
    %38 = math.rsqrt %37 : vector<1x128xf32>
    %c0_12 = arith.constant 0 : index
    %c0_13 = arith.constant 0 : index
    %39 = vector.load %arg3[%c0_12, %c0_13] : memref<1x128xf32, #tpu.memory_space<vmem>>, vector<1x128xf32>
    %40 = arith.mulf %38, %39 : vector<1x128xf32>
    %41 = vector.broadcast %40 : vector<1x128xf32> to vector<32x128xf32>
    %42 = arith.mulf %19, %41 : vector<32x128xf32>
    %c0_14 = arith.constant 0 : index
    %c0_15 = arith.constant 0 : index
    %43 = vector.load %arg4[%c0_14, %c0_15] : memref<1x128xf32, #tpu.memory_space<vmem>>, vector<1x128xf32>
    %44 = vector.broadcast %43 : vector<1x128xf32> to vector<32x128xf32>
    %45 = arith.addf %42, %44 : vector<32x128xf32>
    %cst_16 = arith.constant 0.000000e+00 : f32
    %46 = vector.broadcast %cst_16 : f32 to vector<32x128xf32>
    %47 = arith.maximumf %45, %46 : vector<32x128xf32>
    %c0_17 = arith.constant 0 : index
    %c0_18 = arith.constant 0 : index
    %48 = vector.load %arg5[%c0_17, %c0_18] : memref<32x128xf32, #tpu.memory_space<vmem>>, vector<32x128xf32>
    tpu.vector_store %arg5[%c0_17, %c0_18], %47 {strides = array<i32>} : memref<32x128xf32, #tpu.memory_space<vmem>>, vector<32x128xf32>,
    %49 = vector.shape_cast %47 : vector<32x128xf32> to vector<16x2x128xf32>
    %50 = vector.extract_strided_slice %49 {offsets = [0, 0, 0], sizes = [16, 1, 128], strides = [1, 1, 1]} : vector<16x2x128xf32> to vector<16x1x128xf32>
    %51 = vector.shape_cast %50 : vector<16x1x128xf32> to vector<16x128xf32>
    %52 = vector.extract_strided_slice %49 {offsets = [0, 1, 0], sizes = [16, 1, 128], strides = [1, 1, 1]} : vector<16x2x128xf32> to vector<16x1x128xf32>
    %53 = vector.shape_cast %52 : vector<16x1x128xf32> to vector<16x128xf32>
    %54 = arith.maximumf %51, %53 : vector<16x128xf32>
    %c0_19 = arith.constant 0 : index
    %c0_20 = arith.constant 0 : index
    %55 = vector.load %arg6[%c0_19, %c0_20] : memref<16x128xf32, #tpu.memory_space<vmem>>, vector<16x128xf32>
    tpu.vector_store %arg6[%c0_19, %c0_20], %54 {strides = array<i32>} : memref<16x128xf32, #tpu.memory_space<vmem>>, vector<16x128xf32>,
    return
  }
  func.func @transform_0(%arg0: i32) -> (i32, i32) {
    %c0_i32 = arith.constant 0 : i32
    %c0_i32_0 = arith.constant 0 : i32
    %c0_i32_1 = arith.constant 0 : i32
    return %c0_i32, %c0_i32_0 : i32, i32
  }
  func.func @transform_1(%arg0: i32) -> (i32, i32) {
    %c0_i32 = arith.constant 0 : i32
    %c0_i32_0 = arith.constant 0 : i32
    %c0_i32_1 = arith.constant 0 : i32
    return %c0_i32, %c0_i32_0 : i32, i32
  }
  func.func @transform_2(%arg0: i32) -> (i32, i32) {
    %c0_i32 = arith.constant 0 : i32
    %c0_i32_0 = arith.constant 0 : i32
    %c0_i32_1 = arith.constant 0 : i32
    return %c0_i32, %c0_i32_0 : i32, i32
  }
  func.func @transform_3(%arg0: i32) -> (i32, i32) {
    %c0_i32 = arith.constant 0 : i32
    %c0_i32_0 = arith.constant 0 : i32
    %c0_i32_1 = arith.constant 0 : i32
    return %c0_i32, %c0_i32_0 : i32, i32
  }
  func.func @transform_4(%arg0: i32) -> (i32, i32) {
    %c0_i32 = arith.constant 0 : i32
    %c0_i32_0 = arith.constant 0 : i32
    %c0_i32_1 = arith.constant 0 : i32
    return %c0_i32, %c0_i32_0 : i32, i32
  }
  func.func @transform_5(%arg0: i32) -> (i32, i32) {
    %c0_i32 = arith.constant 0 : i32
    %c0_i32_0 = arith.constant 0 : i32
    %c0_i32_1 = arith.constant 0 : i32
    return %c0_i32, %c0_i32_0 : i32, i32
  }
}

</mosaic_0001>

<bundles_post_ra>
// kernel: tpu_custom_call.1
= control target key start
LH: loop header
LB: loop body
LE: loop exit
PB: predicated region body
PF: predicated region fallthrough
CT: control target
= control target key end

     0   :  { %11 = vsyncpa [#allocation3], 0  ;;  %s1379_s0 = inlined_call_operand.hbm [shape: bf16[32,576], index: 0, kind: input, shape index: {}]   ;;  %s1380_s1 = inlined_call_operand.hbm [shape: bf16[576,128], index: 1, kind: input, shape index: {}]   ;;  %s1381_s2 = inlined_call_operand.vmem [shape: f32[1,128], index: 2, kind: input, shape index: {}]   ;;  %s1382_s3 = inlined_call_operand.vmem [shape: f32[1,128], index: 3, kind: input, shape index: {}]   ;;  %s1383_s4 = inlined_call_operand.hbm [shape: f32[32,128], index: 4, kind: output, shape index: {0}]   ;;  %s1384_s5 = inlined_call_operand.hbm [shape: f32[16,128], index: 5, kind: output, shape index: {1}]  }
   0x1   :  { %12 = vsyncpa [#allocation6], 0 }
   0x2   :  { %13 = vsyncpa [#allocation4], 0 }
   0x3   :  { %14 = vsyncpa [#allocation9], 0  ;;  %s1232_s18 = smov [#allocation2]   ;;  %s1136_s22 = scalar_lea.hbm %s1379_s0, 1280 }
   0x4   :  { %s20_s19 = sshll.u32 %s1232_s18, 4  ;;  %p1137_p0 = scmp.ne.s32.totalorder %s1379_s0, %s1136_s22  ;;  %s21_s19 = int_to_ptr.vmem [resolvable:$true] %s20_s19 }
   0x5   :  { %p1140_p1 = scmp.lt.u32.totalorder %s1136_s22, %s1379_s0 }
   0x7   :  { %p1142_p2 = pnand %p1140_p1, %p1137_p0 }
   0x9   :  { %1145 = shalt.err (!%p1142_p2)
}
   0xa   :  { %s1146_s27 = scalar_lea.vmem %s21_s19, 1280  ;;  %p1151_p4 = scmp.lt.s32.totalorder %s21_s19, %s21_s19 }
   0xb   :  { %p1147_p3 = scmp.ne.s32.totalorder %s21_s19, %s1146_s27  ;;  %p1152_p5 = scmp.lt.s32.totalorder %s1146_s27, %s1146_s27 }
   0xd   :  { %p1153_p6 = por %p1152_p5, %p1151_p4 }
   0xf   :  { %p1154_p7 = pnand %p1153_p6, %p1147_p3 }
  0x11   :  { %1157 = shalt.err (!%p1154_p7)
}
  0x12   :  { %s1233_s28 = smov 320   ;;  %s1234_s29 = smov 20  }
  0x13   :  { %26 = dma.hbm_to_vmem [thread:$0]  %s1379_s0, 1280, %s21_s19, [#allocation3], %s1233_s28, %s1233_s28, %s1234_s29  }
  0x14   :  { %s1235_s7 = smov [#allocation5]   ;;  %s1158_s11 = scalar_lea.hbm %s1380_s1, 4608 }
  0x15   :  { %s32_s8 = sshll.u32 %s1235_s7, 4  ;;  %p1159_p8 = scmp.ne.s32.totalorder %s1380_s1, %s1158_s11  ;;  %s33_s8 = int_to_ptr.vmem [resolvable:$true] %s32_s8 }
  0x16   :  { %p1162_p9 = scmp.lt.u32.totalorder %s1158_s11, %s1380_s1 }
  0x18   :  { %p1164_p10 = pnand %p1162_p9, %p1159_p8 }
  0x1a   :  { %1167 = shalt.err (!%p1164_p10)
}
  0x1b   :  { %s1168_s16 = scalar_lea.vmem %s33_s8, 4608  ;;  %p1173_p12 = scmp.lt.s32.totalorder %s33_s8, %s33_s8 }
  0x1c   :  { %p1169_p11 = scmp.ne.s32.totalorder %s33_s8, %s1168_s16  ;;  %p1174_p13 = scmp.lt.s32.totalorder %s1168_s16, %s1168_s16 }
  0x1e   :  { %p1175_p0 = por %p1174_p13, %p1173_p12 }
  0x20   :  { %p1176_p1 = pnand %p1175_p0, %p1169_p11 }
  0x22   :  { %1179 = shalt.err (!%p1176_p1)
}
  0x23   :  { %s1236_s0 = smov 64   ;;  %s1237_s17 = smov 4  }
  0x24   :  { %38 = dma.hbm_to_vmem [thread:$0]  %s1380_s1, 4608, %s33_s8, [#allocation6], %s1236_s0, %s1236_s0, %s1237_s17  }
  0x25   :  { %1224 = dma.done.wait [#allocation3], 1280  }
  0x26   :  { %1225 = vsyncadd [#allocation3], 4294966016 }
  0x27   :  { %1226 = dma.done.wait [#allocation6], 4608  }
  0x28   :  { %1227 = vsyncadd [#allocation6], 4294962688  ;;  %v1084_v0 = vld [vmem:[#allocation5 + $0x40] sm:$0xff]   ;;  %v1088_v4 = vld [vmem:[#allocation5 + $0x48] sm:$0xff]   ;;  %vm400_vm0 = vcmask 523264   ;;  %s1238_s1 = smov 8  }
  0x29   :  { %v1085_v1 = vld [vmem:[#allocation5 + $0xc0] sm:$0xff]   ;;  %997 = vmatprep.subr.bf16.mxu0 %v1084_v0  ;;  %v1089_v5 = vld [vmem:[#allocation5 + $0xc8] sm:$0xff]   ;;  %v1092_v8 = vld [vmem:[#allocation5 + $0x50] sm:$0xff]   ;;  %s1239_s20 = smov 16   ;;  %s1240_s21 = smov 32  }
  0x2a   :  { %v1086_v2 = vld [vmem:[#allocation5] sm:$0xff]   ;;  %1025 = vmatprep.subr.bf16.mxu1 %v1085_v1  ;;  %v1090_v6 = vld [vmem:[#allocation5 + $0x8] sm:$0xff]   ;;  %v1093_v9 = vld [vmem:[#allocation5 + $0xd0] sm:$0xff]   ;;  %s1242_s26 = smov [#allocation7]  }
  0x2b   :  { %v1087_v3 = vld [vmem:[#allocation5 + $0x80] sm:$0xff]   ;;  %998 = vmatpush3.bf16.msra.mxu0 %v1086_v2  ;;  %v1091_v7 = vld [vmem:[#allocation5 + $0x88] sm:$0xff]   ;;  %v1094_v10 = vld [vmem:[#allocation5 + $0x10] sm:$0xff]   ;;  %s903_s27 = sshll.u32 %s1242_s26, 4  ;;  %s904_s27 = int_to_ptr.vmem [resolvable:$true] %s903_s27 }
  0x2c   :  { %1026 = vmatpush3.bf16.msra.mxu1 %v1087_v3  ;;  %999 = vmatprep.subr.bf16.mxu0 %v1088_v4  ;;  %v1095_v11 = vld [vmem:[#allocation5 + $0x90] sm:$0xff]   ;;  %v1096_v12 = vld [vmem:[#allocation5 + $0x58] sm:$0xff]   ;;  %v1100_v16 = vld [vmem:[#allocation5 + $0x60] sm:$0xff]   ;;  %p1185_p3 = scmp.lt.s32.totalorder %s904_s27, %s904_s27 }
  0x2d   :  { %1027 = vmatprep.subr.bf16.mxu1 %v1089_v5  ;;  %v1097_v13 = vld [vmem:[#allocation5 + $0xd8] sm:$0xff]   ;;  %v1101_v17 = vld [vmem:[#allocation5 + $0xe0] sm:$0xff]   ;;  %v1104_v20 = vld [vmem:[#allocation5 + $0x68] sm:$0xff]  }
  0x2e   :  { %v1098_v14 = vld [vmem:[#allocation5 + $0x18] sm:$0xff]   ;;  %v1102_v18 = vld [vmem:[#allocation5 + $0x20] sm:$0xff]   ;;  %v1105_v21 = vld [vmem:[#allocation5 + $0xe8] sm:$0xff]  }
  0x2f   :  { %1000 = vmatpush3.bf16.msra.mxu0 %v1090_v6  ;;  %v1099_v15 = vld [vmem:[#allocation5 + $0x98] sm:$0xff]   ;;  %v1103_v19 = vld [vmem:[#allocation5 + $0xa0] sm:$0xff]   ;;  %v1106_v22 = vld [vmem:[#allocation5 + $0x28] sm:$0xff]  }
  0x30   :  { %1028 = vmatpush3.bf16.msra.mxu1 %v1091_v7  ;;  %1001 = vmatprep.subr.bf16.mxu0 %v1092_v8  ;;  %v1107_v23 = vld [vmem:[#allocation5 + $0xa8] sm:$0xff]   ;;  %v1108_v24 = vld [vmem:[#allocation5 + $0x70] sm:$0xff]   ;;  %v1112_v28 = vld [vmem:[#allocation5 + $0x78] sm:$0xff]  }
  0x31   :  { %1029 = vmatprep.subr.bf16.mxu1 %v1093_v9  ;;  %v1109_v25 = vld [vmem:[#allocation5 + $0xf0] sm:$0xff]   ;;  %v1113_v29 = vld [vmem:[#allocation5 + $0xf8] sm:$0xff]   ;;  %v1122_v36 = vld [vmem:[#allocation5 + $0x100] sm:$0xff]  }
  0x32   :  { %v1110_v26 = vld [vmem:[#allocation5 + $0x30] sm:$0xff]   ;;  %v1114_v30 = vld [vmem:[#allocation5 + $0x38] sm:$0xff]   ;;  %v1123_v37 = vld [vmem:[#allocation5 + $0x108] sm:$0xff]  }
  0x33   :  { %1002 = vmatpush3.bf16.msra.mxu0 %v1094_v10  ;;  %v1111_v27 = vld [vmem:[#allocation5 + $0xb0] sm:$0xff]   ;;  %v1115_v31 = vld [vmem:[#allocation5 + $0xb8] sm:$0xff]  }
  0x34   :  { %1030 = vmatpush3.bf16.msra.mxu1 %v1095_v11  ;;  %1003 = vmatprep.subr.bf16.mxu0 %v1096_v12  ;;  %v1116_v32 = vld [vmem:[#allocation2] ss:$20 sps:$4 sm:$0xff]   ;;  %v1118_v33 = vld [vmem:[#allocation2 + $0x4] ss:$20 sps:$4 sm:$0xff]   ;;  %v1119_v34 = vld [vmem:[#allocation2 + $0x8] ss:$20 sps:$4 sm:$0xff]  }
  0x35   :  { %1031 = vmatprep.subr.bf16.mxu1 %v1097_v13  ;;  %v1121_v35 = vld [vmem:[#allocation2 + $0xc] ss:$20 sps:$4 sm:$0xff]   ;;  %439 = vmatprep.mubr.bf16.mxu0 %v1118_v33  ;;  %v1126_v39 = vld [vmem:[#allocation2 + $0x34] ss:$20 sps:$4 sm:$0xff]   ;;  %v1129_v42 = vld [vmem:[#allocation2 + $0x30] ss:$20 sps:$4 sm:$0xff]   ;;  %v576_v33 = vlaneseq }
  0x36   :  { %488 = vmatprep.mubr.bf16.mxu1 %v1121_v35  ;;  %v1124_v38 = vld [vmem:[#allocation2 + $0x2c] ss:$20 sps:$4 sm:$0xff]   ;;  %v1128_v40 = vld [vmem:[#allocation2 + $0x28] ss:$20 sps:$4 sm:$0xff]   ;;  %v1132_v43 = vld [vmem:[#allocation2 + $0x10] ss:$20 sps:$4 sm:$0xff]  }
  0x37   :  { %1004 = vmatpush3.bf16.msra.mxu0 %v1098_v14  ;;  %v1130_v41 = vld [vmem:[#allocation5 + $0x110] sm:$0xff]   ;;  %v1131_v44 = vld [vmem:[#allocation5 + $0x118] sm:$0xff]  }
  0x38   :  { %1032 = vmatpush3.bf16.msra.mxu1 %v1099_v15  ;;  %1005 = vmatprep.subr.bf16.mxu0 %v1100_v16  ;;  %v1133_v45 = vld [vmem:[#allocation2 + $0x38] ss:$20 sps:$4 sm:$0xff]  }
  0x39   :  { %1033 = vmatprep.subr.bf16.mxu1 %v1101_v17 }
  0x3b   :  { %1006 = vmatpush3.bf16.msra.mxu0 %v1102_v18 }
  0x3c   :  { %1034 = vmatpush3.bf16.msra.mxu1 %v1103_v19  ;;  %1007 = vmatprep.subr.bf16.mxu0 %v1104_v20 }
  0x3d   :  { %1035 = vmatprep.subr.bf16.mxu1 %v1105_v21 }
  0x3f   :  { %1008 = vmatpush3.bf16.msra.mxu0 %v1106_v22 }
  0x40   :  { %1036 = vmatpush3.bf16.msra.mxu1 %v1107_v23  ;;  %1009 = vmatprep.subr.bf16.mxu0 %v1108_v24 }
  0x41   :  { %1037 = vmatprep.subr.bf16.mxu1 %v1109_v25 }
  0x43   :  { %1010 = vmatpush3.bf16.msra.mxu0 %v1110_v26 }
  0x44   :  { %1038 = vmatpush3.bf16.msra.mxu1 %v1111_v27  ;;  %1011 = vmatprep.subr.bf16.mxu0 %v1112_v28 }
  0x45   :  { %1039 = vmatprep.subr.bf16.mxu1 %v1113_v29 }
  0x47   :  { %1012 = vmatpush3.bf16.msra.mxu0 %v1114_v30 }
  0x48   :  { %1040 = vmatpush3.bf16.msra.mxu1 %v1115_v31  ;;  %1059 = vmatprep.subr.bf16.mxu0 %v1122_v36 }
  0x4a   :  { %440 = vmatmul.mubr.bf16.vlgmr.msra.gmra.mrb[0].mxu0 %v1116_v32 }
  0x4b   :  { %489 = vmatmul.mubr.bf16.vlgmr.msra.gmra.mrb[0].mxu1 %v1119_v34  ;;  %1060 = vmatpush3.bf16.msra.mxu0 %v1122_v36  ;;  %v577_v34 = vshrl.u32 %v576_v33, 7 }
  0x4c   :  { %1061 = vmatprep.subr.bf16.mxu0 %v1123_v37  ;;  %447 = vmatprep.mubr.bf16.mxu0 %v1124_v38 }
  0x4d   :  { %496 = vmatprep.mubr.bf16.mxu1 %v1126_v39  ;;  %v1305_v36 = vsub.s32 0, %v577_v34 }
  0x4f   :  { %1062 = vmatpush3.bf16.msra.mxu0 %v1123_v37 }
  0x50   :  { %1063 = vmatprep.subr.bf16.mxu0 %v1130_v41 }
  0x52   :  { %448 = vmatmul.mubr.bf16.gmra.mrb[4].mxu0 %v1128_v40 }
  0x53   :  { %497 = vmatmul.mubr.bf16.gmra.mrb[4].mxu1 %v1129_v42  ;;  %1067 = vmatprep.mubr.msk.bf16.mxu0 %vm400_vm0, %v1132_v43 }
  0x54   :  { %1064 = vmatpush3.bf16.msra.mxu0 %v1130_v41 }
  0x55   :  { %1065 = vmatprep.subr.bf16.mxu0 %v1131_v44 }
  0x58   :  { %1066 = vmatpush3.bf16.msra.mxu0 %v1131_v44 }
  0x5b   :  { %1068 = vmatmul.mubr.msk.bf16.vlgmr.msra.gmra.mrb[8].mxu0 %vm400_vm0, %v1133_v45 }
 0x11d   :  { %v1013_v46 = vpop.f32.mrb[0].mxu0 }
 0x11e   :  { %v1041_v47 = vpop.f32.mrb[0].mxu1  ;;  %v1014_v48 = vpop.f32.mrb[1].mxu0 }
 0x11f   :  { %v1015_v49 = vadd.f32 %v1014_v48, %v1013_v46  ;;  %v1042_v50 = vpop.f32.mrb[1].mxu1  ;;  %v1016_v51 = vpop.f32.mrb[2].mxu0 }
 0x120   :  { %v1043_v52 = vadd.f32 %v1042_v50, %v1041_v47  ;;  %v1044_v53 = vpop.f32.mrb[2].mxu1  ;;  %v1017_v54 = vpop.f32.mrb[3].mxu0 }
 0x121   :  { %v1018_v55 = vadd.f32 %v1017_v54, %v1016_v51  ;;  %v1045_v56 = vpop.f32.mrb[3].mxu1 }
 0x122   :  { %v1046_v57 = vadd.f32 %v1045_v56, %v1044_v53  ;;  %v491_v58 = vadd.f32 %v1043_v52, %v1015_v49 }
 0x124   :  { %v494_v59 = vadd.f32 %v1046_v57, %v1018_v55 }
 0x125   :  { %v1019_v60 = vpop.f32.mrb[4].mxu0 }
 0x126   :  { %v1047_v61 = vpop.f32.mrb[4].mxu1  ;;  %v1020_v62 = vpop.f32.mrb[5].mxu0 }
 0x127   :  { %v1021_v63 = vadd.f32 %v1020_v62, %v1019_v60  ;;  %v1048_v0 = vpop.f32.mrb[5].mxu1  ;;  %v1022_v1 = vpop.f32.mrb[6].mxu0 }
 0x128   :  { %v1049_v2 = vadd.f32 %v1048_v0, %v1047_v61  ;;  %v1050_v3 = vpop.f32.mrb[6].mxu1  ;;  %v1023_v4 = vpop.f32.mrb[7].mxu0 }
 0x129   :  { %v1024_v5 = vadd.f32 %v1023_v4, %v1022_v1  ;;  %v1051_v6 = vpop.f32.mrb[7].mxu1  ;;  %v1241_v4 = vmov 1983009808  }
 0x12a   :  { %v1052_v7 = vadd.f32 %v1051_v6, %v1050_v3  ;;  %v499_v8 = vadd.f32 %v1049_v2, %v1021_v63  ;;  %v612_v3 = vld [vmem:[%s1381_s2] sm:$0x1]  ;;  %s1180_s2 = scalar_lea.vmem %s904_s27, 512 }
 0x12b   :  { %p1181_p2 = scmp.ne.s32.totalorder %s904_s27, %s1180_s2  ;;  %p1186_p4 = scmp.lt.s32.totalorder %s1180_s2, %s1180_s2 }
 0x12c   :  { %v502_v9 = vadd.f32 %v1052_v7, %v1024_v5  ;;  %v647_v5 = vunpack.c.l.s4 %v1241_v4 }
 0x12d   :  { %p1187_p5 = por %p1186_p4, %p1185_p3 }
 0x12e   :  { %v1069_v10 = vpop.f32.mrb[8].mxu0 }
 0x12f   :  { %v548_v11 = vadd.f32 %v1069_v10, %v499_v8  ;;  %v539_v12 = vpop.f32.mrb[9].mxu0  ;;  %v648_v8 = vunpack.c.0.s8 %v647_v5  ;;  %v980_v10 = vld [vmem:[%s1382_s3] ss:$0 sm:$0xff]  ;;  %p1188_p6 = pnand %p1187_p5, %p1181_p2 }
 0x130   :  { %v540_v13 = vadd.f32 %v539_v12, %v491_v58  ;;  %v1070_v14 = vpop.f32.mrb[10].mxu0 }
 0x131   :  { %v551_v15 = vadd.f32 %v1070_v14, %v502_v9  ;;  %v542_v16 = vpop.f32.mrb[11].mxu0 }
 0x132   :  { %v543_v17 = vadd.f32 %v542_v16, %v494_v59 }
 0x134   :  { %v554_v18 = vadd.f32 %v543_v17, %v540_v13 }
 0x136   :  { %v555_v19 = vadd.f32 %v554_v18, %v548_v11 }
 0x138   :  { %v556_v20 = vadd.f32 %v555_v19, %v551_v15 }
 0x13a   :  { %v557_v21 = vrot.slane %v556_v20, 4 }
 0x13c   :  { %v558_v22 = vadd.f32 %v557_v21, %v556_v20 }
 0x13e   :  { %v559_v23 = vrot.slane %v558_v22, 2 }
 0x140   :  { %v560_v24 = vadd.f32 %v559_v23, %v558_v22 }
 0x142   :  { %v561_v25 = vrot.slane %v560_v24, 1 }
 0x144   :  { %v562_v26 = vadd.f32 %v561_v25, %v560_v24 }
 0x146   :  { %563 = vrot.lane.b32.xlu0 %v562_v26, %s1238_s1 }
 0x1b8   :  { %v564_v27 = vpop.permute.xlu0 %563 }
 0x1b9   :  { %v565_v28 = vadd.f32 %v564_v27, %v562_v26 }
 0x1bb   :  { %566 = vrot.lane.b32.xlu0 %v565_v28, %s1239_s20 }
 0x22d   :  { %v567_v29 = vpop.permute.xlu0 %566 }
 0x22e   :  { %v568_v30 = vadd.f32 %v567_v29, %v565_v28 }
 0x230   :  { %569 = vrot.lane.b32.xlu1 %v568_v30, %s1240_s21 }
 0x2a2   :  { %v570_v31 = vpop.permute.xlu1 %569 }
 0x2a3   :  { %v571_v32 = vadd.f32 %v570_v31, %v568_v30 }
 0x2a5   :  { %572 = vrot.lane.b32.xlu1 %v571_v32, %s1236_s0 }
 0x317   :  { %v573_v35 = vpop.permute.xlu1 %572 }
 0x318   :  { %v574_v37 = vadd.f32 %v573_v35, %v571_v32 }
 0x31a   :  { %v575_v38 = vmul.f32 0.001953125, %v574_v37 }
 0x31c   :  { %v579_v39 = vrot.slane %v575_v38, %v1305_v36 }
 0x31e   :  { %v580_v40 = vsub.f32 %v540_v13, %v579_v39  ;;  %v581_v41 = vsub.f32 %v543_v17, %v579_v39  ;;  %v582_v42 = vsub.f32 %v548_v11, %v579_v39  ;;  %v583_v43 = vsub.f32 %v551_v15, %v579_v39 }
 0x31f   :  { %v651_v15 = vsub.s32 %v648_v8, %v577_v34 }
 0x320   :  { %v584_v44 = vmul.f32 %v580_v40, %v580_v40  ;;  %v585_v45 = vmul.f32 %v581_v41, %v581_v41  ;;  %v586_v46 = vmul.f32 %v582_v42, %v582_v42  ;;  %v587_v48 = vmul.f32 %v583_v43, %v583_v43 }
 0x322   :  { %v588_v47 = vadd.f32 %v585_v45, %v584_v44 }
 0x324   :  { %v589_v49 = vadd.f32 %v588_v47, %v586_v46 }
 0x326   :  { %v590_v50 = vadd.f32 %v589_v49, %v587_v48 }
 0x328   :  { %v591_v51 = vrot.slane %v590_v50, 4 }
 0x32a   :  { %v592_v52 = vadd.f32 %v591_v51, %v590_v50 }
 0x32c   :  { %v593_v53 = vrot.slane %v592_v52, 2 }
 0x32e   :  { %v594_v54 = vadd.f32 %v593_v53, %v592_v52 }
 0x330   :  { %v595_v55 = vrot.slane %v594_v54, 1 }
 0x332   :  { %v596_v56 = vadd.f32 %v595_v55, %v594_v54 }
 0x334   :  { %597 = vrot.lane.b32.xlu0 %v596_v56, %s1238_s1 }
 0x3a6   :  { %v598_v57 = vpop.permute.xlu0 %597 }
 0x3a7   :  { %v599_v58 = vadd.f32 %v598_v57, %v596_v56 }
 0x3a9   :  { %600 = vrot.lane.b32.xlu1 %v599_v58, %s1239_s20 }
 0x41b   :  { %v601_v59 = vpop.permute.xlu1 %600 }
 0x41c   :  { %v602_v60 = vadd.f32 %v601_v59, %v599_v58 }
 0x41e   :  { %603 = vrot.lane.b32.xlu0 %v602_v60, %s1240_s21 }
 0x490   :  { %v604_v61 = vpop.permute.xlu0 %603 }
 0x491   :  { %v605_v62 = vadd.f32 %v604_v61, %v602_v60 }
 0x493   :  { %606 = vrot.lane.b32.xlu1 %v605_v62, %s1236_s0 }
 0x505   :  { %v607_v63 = vpop.permute.xlu1 %606 }
 0x506   :  { %v608_v0 = vadd.f32 %v607_v63, %v605_v62 }
 0x508   :  { %v609_v1 = vmul.f32 0.001953125, %v608_v0 }
 0x50a   :  { %v610_v2 = vadd.f32 1e-05, %v609_v1 }
 0x50c   :  { %1134 = vrsqrt.f32 %v610_v2 }
 0x516   :  { %v1135_v6 = vpop.eup %1134 }
 0x517   :  { %v613_v7 = vmul.f32 %v1135_v6, %v612_v3 }
 0x519   :  { %v617_v9 = vrot.slane %v613_v7, %v1305_v36 }
 0x51b   :  { %v618_v11 = vmul.f32 %v617_v9, %v580_v40  ;;  %v619_v12 = vmul.f32 %v617_v9, %v581_v41  ;;  %v620_v13 = vmul.f32 %v617_v9, %v582_v42  ;;  %v621_v14 = vmul.f32 %v617_v9, %v583_v43 }
 0x51d   :  { %v629_v16 = vadd.f32 %v980_v10, %v618_v11  ;;  %v630_v17 = vadd.f32 %v980_v10, %v619_v12  ;;  %v631_v18 = vadd.f32 %v980_v10, %v620_v13  ;;  %v632_v19 = vadd.f32 %v980_v10, %v621_v14 }
 0x51f   :  { %v633_v20 = vmax.f32 %v629_v16, 0.0  ;;  %v634_v21 = vmax.f32 %v630_v17, 0.0  ;;  %v635_v22 = vmax.f32 %v631_v18, 0.0  ;;  %v636_v23 = vmax.f32 %v632_v19, 0.0 }
 0x521   :  { %637 = vst [vmem:[#allocation7] sm:$0xff] %v633_v20  ;;  %638 = vst [vmem:[#allocation7 + $0x8] sm:$0xff] %v634_v21  ;;  %v645_v24 = vcombine.high %v633_v20, %v633_v20  ;;  %v652_v25 = vrot.slane %v633_v20, %v651_v15  ;;  %v679_v26 = vcombine.high %v635_v22, %v635_v22 }
 0x522   :  { %639 = vst [vmem:[#allocation7 + $0x10] sm:$0xff] %v635_v22  ;;  %640 = vst [vmem:[#allocation7 + $0x18] sm:$0xff] %v636_v23  ;;  %v669_v27 = vrot.slane %v634_v21, %v651_v15  ;;  %v686_v28 = vrot.slane %v635_v22, %v651_v15 }
 0x523   :  { %1191 = shalt.err (!%p1188_p6)
}
 0x524   :  { %s1192_s29 = scalar_lea.hbm %s1383_s4, 512 }
 0x525   :  { %p1193_p7 = scmp.ne.s32.totalorder %s1383_s4, %s1192_s29  ;;  %p1196_p8 = scmp.lt.u32.totalorder %s1192_s29, %s1383_s4 }
 0x527   :  { %p1198_p9 = pnand %p1196_p8, %p1193_p7 }
 0x529   :  { %1201 = shalt.err (!%p1198_p9)
}
 0x52a   :  { %s1243_s9 = smov 128   ;;  %v662_v29 = vcombine.high %v634_v21, %v634_v21  ;;  %v696_v30 = vcombine.high %v636_v23, %v636_v23  ;;  %v659_v31 = vrot.slane %v645_v24, %v651_v15  ;;  %v660_v32 = vcombine.high %v652_v25, %v652_v25 }
 0x52b   :  { %909 = dma.vmem_to_hbm [thread:$0]  %s904_s27, 512, %s1383_s4, [#allocation4], %s1243_s9, %s1243_s9, %s1238_s1   ;;  %v693_v33 = vrot.slane %v679_v26, %v651_v15  ;;  %v703_v34 = vrot.slane %v636_v23, %v651_v15  ;;  %v694_v35 = vcombine.high %v686_v28, %v686_v28  ;;  %v677_v41 = vcombine.high %v669_v27, %v669_v27 }
 0x52c   :  { %v661_v37 = vcombine.high %v659_v31, %v659_v31  ;;  %v676_v38 = vrot.slane %v662_v29, %v651_v15  ;;  %v982_v40 = vrot.slane %v660_v32, 9  ;;  %v710_v42 = vrot.slane %v696_v30, %v651_v15  ;;  %s1244_s4 = smov [#allocation8]  }
 0x52d   :  { %v695_v39 = vcombine.high %v693_v33, %v693_v33  ;;  %v981_v43 = vrot.slane %v652_v25, 9  ;;  %v711_v44 = vcombine.high %v703_v34, %v703_v34  ;;  %v983_v45 = vrot.slane %v659_v31, 9  ;;  %s915_s12 = sshll.u32 %s1244_s4, 4  ;;  %s916_s12 = int_to_ptr.vmem [resolvable:$true] %s915_s12 }
 0x52e   :  { %v984_v46 = vrot.slane %v661_v37, 9  ;;  %v989_v47 = vrot.slane %v686_v28, 9  ;;  %v990_v48 = vrot.slane %v694_v35, 9  ;;  %vm873_vm1 = vcmask 1041409   ;;  %s1202_s13 = scalar_lea.vmem %s916_s12, 256  ;;  %p1207_p11 = scmp.lt.s32.totalorder %s916_s12, %s916_s12 }
 0x52f   :  { %vm875_vm2 = vcmask 1042434   ;;  %v678_v49 = vcombine.high %v676_v38, %v676_v38  ;;  %v712_v50 = vcombine.high %v710_v42, %v710_v42  ;;  %v991_v51 = vrot.slane %v693_v33, 9  ;;  %p1203_p10 = scmp.ne.s32.totalorder %s916_s12, %s1202_s13  ;;  %p1208_p12 = scmp.lt.s32.totalorder %s1202_s13, %s1202_s13 }
 0x530   :  { %v992_v52 = vrot.slane %v695_v39, 9  ;;  %vm877_vm3 = vcmask 1043459   ;;  %v985_v53 = vrot.slane %v669_v27, 9  ;;  %v986_v54 = vrot.slane %v677_v41, 9 }
 0x531   :  { %v993_v55 = vrot.slane %v703_v34, 9  ;;  %v778_v56 = vmax.f32 %v660_v32, %v982_v40  ;;  %vm879_vm4 = vcmask 1044484   ;;  %v777_v57 = vmax.f32 %v652_v25, %v981_v43  ;;  %p1209_p13 = por %p1208_p12, %p1207_p11 }
 0x532   :  { %v994_v58 = vrot.slane %v711_v44, 9  ;;  %v779_v59 = vmax.f32 %v659_v31, %v983_v45  ;;  %v780_v60 = vmax.f32 %v661_v37, %v984_v46  ;;  %vm881_vm5 = vcmask 1045509  }
 0x533   :  { %v785_v61 = vmax.f32 %v686_v28, %v989_v47  ;;  %v786_v62 = vmax.f32 %v694_v35, %v990_v48  ;;  %v787_v63 = vmax.f32 %v693_v33, %v991_v51  ;;  %v788_v0 = vmax.f32 %v695_v39, %v992_v52  ;;  %p1210_p0 = pnand %p1209_p13, %p1203_p10 }
 0x534   :  { %v987_v1 = vrot.slane %v676_v38, 9  ;;  %v988_v2 = vrot.slane %v678_v49, 9  ;;  %v995_v3 = vrot.slane %v710_v42, 9  ;;  %v996_v4 = vrot.slane %v712_v50, 9 }
 0x535   :  { %v781_v5 = vmax.f32 %v669_v27, %v985_v53  ;;  %v782_v6 = vmax.f32 %v677_v41, %v986_v54  ;;  %v789_v7 = vmax.f32 %v703_v34, %v993_v55  ;;  %v816_v8 = vrot.slane %v778_v56, %v1305_v36 }
 0x536   :  { %v790_v9 = vmax.f32 %v711_v44, %v994_v58  ;;  %v812_v10 = vrot.slane %v777_v57, %v1305_v36  ;;  %v820_v11 = vrot.slane %v779_v59, %v1305_v36  ;;  %v824_v12 = vrot.slane %v780_v60, %v1305_v36 }
 0x537   :  { %v844_v13 = vrot.slane %v785_v61, %v1305_v36  ;;  %v848_v14 = vrot.slane %v786_v62, %v1305_v36  ;;  %v852_v15 = vrot.slane %v787_v63, %v1305_v36  ;;  %v856_v16 = vrot.slane %v788_v0, %v1305_v36 }
 0x538   :  { %v783_v17 = vmax.f32 %v676_v38, %v987_v1  ;;  %v791_v18 = vmax.f32 %v710_v42, %v995_v3  ;;  %vm883_vm6 = vcmask 1046534   ;;  %vm885_vm7 = vcmask 1047559  }
 0x539   :  { %v784_v19 = vmax.f32 %v678_v49, %v988_v2  ;;  %v792_v20 = vmax.f32 %v712_v50, %v996_v4  ;;  %v874_v21 = vsel %vm873_vm1, %v816_v8, %v812_v10  ;;  %v887_v22 = vsel %vm873_vm1, %v848_v14, %v844_v13 }
 0x53a   :  { %v828_v23 = vrot.slane %v781_v5, %v1305_v36  ;;  %v860_v24 = vrot.slane %v789_v7, %v1305_v36  ;;  %v876_v25 = vsel %vm875_vm2, %v820_v11, %v874_v21  ;;  %v888_v26 = vsel %vm875_vm2, %v852_v15, %v887_v22 }
 0x53b   :  { %v832_v27 = vrot.slane %v782_v6, %v1305_v36  ;;  %v864_v28 = vrot.slane %v790_v9, %v1305_v36  ;;  %v878_v29 = vsel %vm877_vm3, %v824_v12, %v876_v25  ;;  %v889_v30 = vsel %vm877_vm3, %v856_v16, %v888_v26 }
 0x53c   :  { %v836_v31 = vrot.slane %v783_v17, %v1305_v36  ;;  %v868_v32 = vrot.slane %v791_v18, %v1305_v36  ;;  %v880_v33 = vsel %vm879_vm4, %v828_v23, %v878_v29  ;;  %v890_v34 = vsel %vm879_vm4, %v860_v24, %v889_v30 }
 0x53d   :  { %v840_v35 = vrot.slane %v784_v19, %v1305_v36  ;;  %v872_v37 = vrot.slane %v792_v20, %v1305_v36  ;;  %v882_v38 = vsel %vm881_vm5, %v832_v27, %v880_v33  ;;  %v891_v39 = vsel %vm881_vm5, %v864_v28, %v890_v34 }
 0x53e   :  { %v884_v40 = vsel %vm883_vm6, %v836_v31, %v882_v38  ;;  %v892_v41 = vsel %vm883_vm6, %v868_v32, %v891_v39 }
 0x53f   :  { %v886_v42 = vsel %vm885_vm7, %v840_v35, %v884_v40  ;;  %v893_v43 = vsel %vm885_vm7, %v872_v37, %v892_v41 }
 0x540   :  { %896 = vst [vmem:[#allocation8] sm:$0xff] %v886_v42  ;;  %897 = vst [vmem:[#allocation8 + $0x8] sm:$0xff] %v893_v43 }
 0x541   :  { %1213 = shalt.err (!%p1210_p0)
}
 0x542   :  { %s1214_s16 = scalar_lea.hbm %s1384_s5, 256 }
 0x543   :  { %p1215_p1 = scmp.ne.s32.totalorder %s1384_s5, %s1214_s16  ;;  %p1218_p2 = scmp.lt.u32.totalorder %s1214_s16, %s1384_s5 }
 0x545   :  { %p1220_p3 = pnand %p1218_p2, %p1215_p1 }
 0x547   :  { %1223 = shalt.err (!%p1220_p3)
}
 0x548   :  { %921 = dma.vmem_to_hbm [thread:$0]  %s916_s12, 256, %s1384_s5, [#allocation9], %s1243_s9, %s1243_s9, %s1238_s1  }
 0x549   :  { %1228 = dma.done.wait [#allocation4], 512  }
 0x54a   :  { %1229 = vsyncadd [#allocation4], 4294966784 }
 0x54b   :  { %1230 = dma.done.wait [#allocation9], 256  }
 0x54c   :  { %1231 = vsyncadd [#allocation9], 4294967040 }
 0x54d   :  { %928 = vsyncpa [#allocation3], 1 }
 0x54e   :  { %929 = vsyncpa [#allocation6], 1 }
 0x54f   :  { %930 = vsyncpa [#allocation4], 1 }
 0x550   :  { %931 = vsyncpa [#allocation9], 1 }

</bundles_post_ra>
